<compile_context>
chip_gen: v5e
topology: v5e:2x2
jax: 0.10.0
libtpu: 0.0.40
codegen_flags: <defaults>
</compile_context>

<pallas_src>
import jax
import jax.numpy as jnp
from jax.experimental import pallas as pl
from jax.experimental.pallas import tpu as pltpu
import numpy as np

HIDDEN = 64          # logical hidden width (matches the PyTorch module)
HIDDEN_PAD = 128     # lane-padded hidden width used inside the kernel


def _orthogonal(key, rows, cols, gain):
    """Matches torch.nn.init.orthogonal_ for a (rows, cols) weight."""
    a = jax.random.normal(key, (rows, cols), dtype=jnp.float32)
    flat = a.T if rows < cols else a            # QR of the tall matrix
    q, r = jnp.linalg.qr(flat)
    d = jnp.diag(r)
    q = q * jnp.where(d >= 0, 1.0, -1.0)[None, :]   # sign fix (never zero here)
    if rows < cols:
        q = q.T
    return gain * q


def policy_kernel(x_ref, w1_ref, b1_ref, w2_ref, b2_ref, w3_ref, b3_ref,
                  mean_ref):
    # One batch tile per grid step: three MXU matmuls + VPU/EUP tanh, fused.
    x = x_ref[...]
    h1 = jnp.tanh(jnp.dot(x, w1_ref[...], preferred_element_type=jnp.float32)
                  + b1_ref[...])
    h1 = h1.astype(w2_ref.dtype)            # no-op in f32 mode; bf16 if enabled
    h2 = jnp.tanh(jnp.dot(h1, w2_ref[...], preferred_element_type=jnp.float32)
                  + b2_ref[...])
    h2 = h2.astype(w3_ref.dtype)
    mean_ref[...] = (jnp.dot(h2, w3_ref[...],
                             preferred_element_type=jnp.float32)
                     + b3_ref[...]).astype(mean_ref.dtype)


def policy_forward(state, params, *, block_batch=2048, use_bf16=False):
    """Returns (action_mean, action_std) — the parameters of Normal(mean, std)."""
    w1, b1, w2, b2, w3, b3, logstd = params
    batch, state_dim = state.shape
    action_dim = w3.shape[1]
    hp = w1.shape[1]        # HIDDEN_PAD

    # Batch tile: multiple of 8 sublanes, capped at block_batch.
    tb = min(block_batch, max(8, ((batch + 7) // 8) * 8))
    batch_padded = pl.cdiv(batch, tb) * tb
    # Ensure >=2 grid steps when possible so v7x can shard the batch axis
    # across both TensorCores (harmless single extra step on v5e/v6e).
    if batch_padded // tb < 2 and batch_padded >= 16:
        tb = ((batch_padded // 2 + 7) // 8) * 8
        batch_padded = pl.cdiv(batch, tb) * tb
    if batch_padded != batch:
        state = jnp.pad(state, ((0, batch_padded - batch), (0, 0)))
    grid = (batch_padded // tb,)

    if use_bf16:
        # Optional numerics trade (off by default): bf16 MXU inputs, f32 acc.
        state = state.astype(jnp.bfloat16)
        w1c, w2c, w3c = (w.astype(jnp.bfloat16) for w in (w1, w2, w3))
    else:
        w1c, w2c, w3c = w1, w2, w3

    row_spec = pl.BlockSpec((tb, state_dim), lambda i: (i, 0))
    out_spec = pl.BlockSpec((tb, action_dim), lambda i: (i, 0))

    def const_spec(arr):
        # Full-array block, constant index -> VMEM-resident across grid steps.
        return pl.BlockSpec(arr.shape, lambda i: (0, 0))

    flops = 2 * batch_padded * (state_dim * hp + hp * hp + hp * action_dim)
    transcendentals = 2 * batch_padded * hp
    itemsize = 2 if use_bf16 else 4
    bytes_accessed = (itemsize * (batch_padded * state_dim
                                  + state_dim * hp + hp * hp + hp * action_dim)
                      + 4 * (2 * hp + action_dim + batch_padded * action_dim))

    mean_pad = pl.pallas_call(
        policy_kernel,
        out_shape=jax.ShapeDtypeStruct((batch_padded, action_dim), jnp.float32),
        grid=grid,
        in_specs=[row_spec, const_spec(w1c), const_spec(b1), const_spec(w2c),
                  const_spec(b2), const_spec(w3c), const_spec(b3)],
        out_specs=out_spec,
        compiler_params=pltpu.CompilerParams(
            dimension_semantics=("parallel",)),
        cost_estimate=pl.CostEstimate(
            flops=flops, transcendentals=transcendentals,
            bytes_accessed=bytes_accessed),
    )(state, w1c, b1, w2c, b2, w3c, b3)

    action_mean = mean_pad[:batch] if batch_padded != batch else mean_pad
    # actor_logstd.expand_as(action_mean) then exp — batch-independent.
    action_std = jnp.broadcast_to(jnp.exp(logstd), action_mean.shape)
    return action_mean, action_std


def init_policy_params(key, state_dim, action_dim):
    k1, k2, k3 = jax.random.split(key, 3)
    sqrt2 = float(np.sqrt(2.0))

    # torch weights are (out, in); orthogonal-init in that shape, then store
    # transposed (in, out).  Hidden width zero-padded 64 -> 128 (exact math on
    # the real columns); output width kept at the true action_dim.
    w1_t = _orthogonal(k1, HIDDEN, state_dim, sqrt2)          # (64, S)
    w2_t = _orthogonal(k2, HIDDEN, HIDDEN, sqrt2)             # (64, 64)
    w3_t = _orthogonal(k3, action_dim, HIDDEN, 0.01)          # (A, 64)

    w1 = jnp.zeros((state_dim, HIDDEN_PAD), jnp.float32).at[:, :HIDDEN].set(w1_t.T)
    b1 = jnp.zeros((1, HIDDEN_PAD), jnp.float32)
    w2 = jnp.zeros((HIDDEN_PAD, HIDDEN_PAD), jnp.float32).at[:HIDDEN, :HIDDEN].set(w2_t.T)
    b2 = jnp.zeros((1, HIDDEN_PAD), jnp.float32)
    w3 = jnp.zeros((HIDDEN_PAD, action_dim), jnp.float32).at[:HIDDEN, :].set(w3_t.T)
    b3 = jnp.zeros((1, action_dim), jnp.float32)
    logstd = jnp.zeros((1, action_dim), jnp.float32)          # actor_logstd
    return (w1, b1, w2, b2, w3, b3, logstd)


if __name__ == "__main__":
    key = jax.random.PRNGKey(0)
    k_params, k_state = jax.random.split(key)

    batch, state_dim, action_dim = 8, 8, 4
    params = init_policy_params(k_params, state_dim, action_dim)
    state = jax.random.normal(k_state, (batch, state_dim), dtype=jnp.float32)

    mean, std = policy_forward(state, params)
    jax.block_until_ready((mean, std))

    # Pure-JAX reference of the same math (zero padding makes the padded
    # hidden width exactly reproduce the unpadded 64-wide MLP).
    w1, b1, w2, b2, w3, b3, logstd = params
    h = jnp.tanh(state @ w1 + b1)
    h = jnp.tanh(h @ w2 + b2)
    ref_mean = h @ w3 + b3
    ref_std = jnp.broadcast_to(jnp.exp(logstd), ref_mean.shape)
    assert mean.shape == (batch, action_dim) and std.shape == (batch, action_dim)
    assert jnp.allclose(mean, ref_mean, atol=1e-5)
    assert jnp.allclose(std, ref_std, atol=1e-6)

    # Exercise a multi-step grid (covers the >=2-step / ragged-tail paths).
    state_big = jax.random.normal(k_state, (50, state_dim), dtype=jnp.float32)
    mean_big, std_big = policy_forward(state_big, params, block_batch=32)
    jax.block_until_ready((mean_big, std_big))
    h = jnp.tanh(state_big @ w1 + b1)
    h = jnp.tanh(h @ w2 + b2)
    assert jnp.allclose(mean_big, h @ w3 + b3, atol=1e-5)
    assert mean_big.shape == (50, action_dim)

    print("KERNEL_OK")
</pallas_src>

<mosaic_0001>
module attributes {stable_mosaic.version = 11 : i64} {
  func.func @policy_kernel(%arg0: i32, %arg1: memref<8x8xf32, #tpu.memory_space<vmem>>, %arg2: memref<8x128xf32, #tpu.memory_space<vmem>>, %arg3: memref<1x128xf32, #tpu.memory_space<vmem>>, %arg4: memref<128x128xf32, #tpu.memory_space<vmem>>, %arg5: memref<1x128xf32, #tpu.memory_space<vmem>>, %arg6: memref<128x4xf32, #tpu.memory_space<vmem>>, %arg7: memref<1x4xf32, #tpu.memory_space<vmem>>, %arg8: memref<8x4xf32, #tpu.memory_space<vmem>>) attributes {dimension_semantics = [#tpu.dimension_semantics<parallel>], iteration_bounds = array<i64: 1>, scalar_prefetch = 0 : i64, scratch_operands = 0 : i64, tpu.core_type = #tpu.core_type<tc>, window_params = [{transform_indices = @transform_0, window_bounds = array<i64: 8, 8>}, {pipeline_mode = #tpu.pipeline_mode<synchronous>, transform_indices = @transform_1, window_bounds = array<i64: 8, 128>}, {pipeline_mode = #tpu.pipeline_mode<synchronous>, transform_indices = @transform_2, window_bounds = array<i64: 1, 128>}, {pipeline_mode = #tpu.pipeline_mode<synchronous>, transform_indices = @transform_3, window_bounds = array<i64: 128, 128>}, {pipeline_mode = #tpu.pipeline_mode<synchronous>, transform_indices = @transform_4, window_bounds = array<i64: 1, 128>}, {pipeline_mode = #tpu.pipeline_mode<synchronous>, transform_indices = @transform_5, window_bounds = array<i64: 128, 4>}, {pipeline_mode = #tpu.pipeline_mode<synchronous>, transform_indices = @transform_6, window_bounds = array<i64: 1, 4>}, {transform_indices = @transform_7, window_bounds = array<i64: 8, 4>}]} {
    %c0 = arith.constant 0 : index
    %c0_0 = arith.constant 0 : index
    %0 = vector.load %arg1[%c0, %c0_0] : memref<8x8xf32, #tpu.memory_space<vmem>>, vector<8x8xf32>
    %c0_1 = arith.constant 0 : index
    %c0_2 = arith.constant 0 : index
    %1 = vector.load %arg2[%c0_1, %c0_2] : memref<8x128xf32, #tpu.memory_space<vmem>>, vector<8x128xf32>
    %cst = arith.constant dense<0.000000e+00> : vector<8x128xf32>
    %2 = tpu.matmul %0, %1, %cst {dimension_numbers = #tpu.dot_dimension_numbers<[1], [0], [0], [1], [0, 0, 1, 1], [], []>} : vector<8x8xf32>, vector<8x128xf32>, vector<8x128xf32> -> vector<8x128xf32>
    %c0_3 = arith.constant 0 : index
    %c0_4 = arith.constant 0 : index
    %3 = vector.load %arg3[%c0_3, %c0_4] : memref<1x128xf32, #tpu.memory_space<vmem>>, vector<1x128xf32>
    %4 = vector.broadcast %3 : vector<1x128xf32> to vector<8x128xf32>
    %5 = arith.addf %2, %4 : vector<8x128xf32>
    %6 = math.tanh %5 : vector<8x128xf32>
    %c0_5 = arith.constant 0 : index
    %c0_6 = arith.constant 0 : index
    %7 = vector.load %arg4[%c0_5, %c0_6] : memref<128x128xf32, #tpu.memory_space<vmem>>, vector<128x128xf32>
    %cst_7 = arith.constant dense<0.000000e+00> : vector<8x128xf32>
    %8 = tpu.matmul %6, %7, %cst_7 {dimension_numbers = #tpu.dot_dimension_numbers<[1], [0], [0], [1], [0, 0, 1, 1], [], []>} : vector<8x128xf32>, vector<128x128xf32>, vector<8x128xf32> -> vector<8x128xf32>
    %c0_8 = arith.constant 0 : index
    %c0_9 = arith.constant 0 : index
    %9 = vector.load %arg5[%c0_8, %c0_9] : memref<1x128xf32, #tpu.memory_space<vmem>>, vector<1x128xf32>
    %10 = vector.broadcast %9 : vector<1x128xf32> to vector<8x128xf32>
    %11 = arith.addf %8, %10 : vector<8x128xf32>
    %12 = math.tanh %11 : vector<8x128xf32>
    %c0_10 = arith.constant 0 : index
    %c0_11 = arith.constant 0 : index
    %13 = vector.load %arg6[%c0_10, %c0_11] : memref<128x4xf32, #tpu.memory_space<vmem>>, vector<128x4xf32>
    %cst_12 = arith.constant dense<0.000000e+00> : vector<8x4xf32>
    %14 = tpu.matmul %12, %13, %cst_12 {dimension_numbers = #tpu.dot_dimension_numbers<[1], [0], [0], [1], [0, 0, 1, 1], [], []>} : vector<8x128xf32>, vector<128x4xf32>, vector<8x4xf32> -> vector<8x4xf32>
    %c0_13 = arith.constant 0 : index
    %c0_14 = arith.constant 0 : index
    %15 = vector.load %arg7[%c0_13, %c0_14] : memref<1x4xf32, #tpu.memory_space<vmem>>, vector<1x4xf32>
    %16 = vector.broadcast %15 : vector<1x4xf32> to vector<8x4xf32>
    %17 = arith.addf %14, %16 : vector<8x4xf32>
    %c0_15 = arith.constant 0 : index
    %c0_16 = arith.constant 0 : index
    %18 = vector.load %arg8[%c0_15, %c0_16] : memref<8x4xf32, #tpu.memory_space<vmem>>, vector<8x4xf32>
    tpu.vector_store %arg8[%c0_15, %c0_16], %17 {strides = array<i32>} : memref<8x4xf32, #tpu.memory_space<vmem>>, vector<8x4xf32>,
    return
  }
  func.func @transform_0(%arg0: i32) -> (i32, i32) {
    %c0_i32 = arith.constant 0 : i32
    %c0_i32_0 = arith.constant 0 : i32
    return %arg0, %c0_i32 : i32, i32
  }
  func.func @transform_1(%arg0: i32) -> (i32, i32) {
    %c0_i32 = arith.constant 0 : i32
    %c0_i32_0 = arith.constant 0 : i32
    %c0_i32_1 = arith.constant 0 : i32
    return %c0_i32, %c0_i32_0 : i32, i32
  }
  func.func @transform_2(%arg0: i32) -> (i32, i32) {
    %c0_i32 = arith.constant 0 : i32
    %c0_i32_0 = arith.constant 0 : i32
    %c0_i32_1 = arith.constant 0 : i32
    return %c0_i32, %c0_i32_0 : i32, i32
  }
  func.func @transform_3(%arg0: i32) -> (i32, i32) {
    %c0_i32 = arith.constant 0 : i32
    %c0_i32_0 = arith.constant 0 : i32
    %c0_i32_1 = arith.constant 0 : i32
    return %c0_i32, %c0_i32_0 : i32, i32
  }
  func.func @transform_4(%arg0: i32) -> (i32, i32) {
    %c0_i32 = arith.constant 0 : i32
    %c0_i32_0 = arith.constant 0 : i32
    %c0_i32_1 = arith.constant 0 : i32
    return %c0_i32, %c0_i32_0 : i32, i32
  }
  func.func @transform_5(%arg0: i32) -> (i32, i32) {
    %c0_i32 = arith.constant 0 : i32
    %c0_i32_0 = arith.constant 0 : i32
    %c0_i32_1 = arith.constant 0 : i32
    return %c0_i32, %c0_i32_0 : i32, i32
  }
  func.func @transform_6(%arg0: i32) -> (i32, i32) {
    %c0_i32 = arith.constant 0 : i32
    %c0_i32_0 = arith.constant 0 : i32
    %c0_i32_1 = arith.constant 0 : i32
    return %c0_i32, %c0_i32_0 : i32, i32
  }
  func.func @transform_7(%arg0: i32) -> (i32, i32) {
    %c0_i32 = arith.constant 0 : i32
    %c0_i32_0 = arith.constant 0 : i32
    return %arg0, %c0_i32 : i32, i32
  }
}

</mosaic_0001>

<bundles_post_ra>
// kernel: tpu_custom_call.1
= control target key start
LH: loop header
LB: loop body
LE: loop exit
PB: predicated region body
PF: predicated region fallthrough
CT: control target
= control target key end

     0   :  { %12 = vsyncpa [#allocation3], 0  ;;  %s392_s0 = inlined_call_operand.hbm [shape: f32[8,8], index: 0, kind: input, shape index: {}]   ;;  %s393_s1 = inlined_call_operand.hbm [shape: f32[8,128], index: 1, kind: input, shape index: {}]   ;;  %s394_s2 = inlined_call_operand.vmem [shape: f32[1,128], index: 2, kind: input, shape index: {}]   ;;  %s395_s3 = inlined_call_operand.vmem [shape: f32[128,128], index: 3, kind: input, shape index: {}]   ;;  %s396_s4 = inlined_call_operand.vmem [shape: f32[1,128], index: 4, kind: input, shape index: {}]   ;;  %s397_s5 = inlined_call_operand.vmem [shape: f32[128,4], index: 5, kind: input, shape index: {}]   ;;  %s398_s6 = inlined_call_operand.vmem [shape: f32[1,4], index: 6, kind: input, shape index: {}]   ;;  %s399_s7 = inlined_call_operand.vmem [shape: f32[8,4], index: 7, kind: output, shape index: {}]  }
   0x1   :  { %s19_s26 = sshll.u32 %s392_s0, 4  ;;  %s20_s26 = int_to_ptr.hbm [resolvable:$true] %s19_s26 }
   0x2   :  { %13 = vsyncpa [#allocation5], 0  ;;  %s236_s27 = smov [#allocation2]   ;;  %s30_s8 = sshll.u32 %s393_s1, 4  ;;  %s31_s8 = int_to_ptr.hbm [resolvable:$true] %s30_s8 }
   0x3   :  { %s21_s28 = sshll.u32 %s236_s27, 4  ;;  %s237_s9 = smov [#allocation4]   ;;  %s22_s28 = int_to_ptr.vmem [resolvable:$true] %s21_s28 }
   0x4   :  { %24 = dma.hbm_to_vmem [thread:$0]  %s20_s26, 128, %s22_s28, [#allocation3]  }
   0x5   :  { %s32_s10 = sshll.u32 %s237_s9, 4  ;;  %s33_s10 = int_to_ptr.vmem [resolvable:$true] %s32_s10 }
   0x6   :  { %35 = dma.hbm_to_vmem [thread:$0]  %s31_s8, 128, %s33_s10, [#allocation5]  }
   0x7   :  { %232 = dma.done.wait [#allocation3], 128  }
   0x8   :  { %233 = vsyncadd [#allocation3], 4294967168 }
   0x9   :  { %234 = dma.done.wait [#allocation5], 128  }
   0xa   :  { %235 = vsyncadd [#allocation5], 4294967168  ;;  %vm60_vm0 = vcmask 64512   ;;  %v55_v0 = vld [vmem:[#allocation4] sm:$0xff]  ;;  %v54_v1 = vld [vmem:[#allocation2] sm:$0xff]  ;;  %vm166_vm1 = vcmask 31744  }
   0xb   :  { %v100_v2 = vld [vmem:[%s395_s3 + $0x78] sm:$0xff]  ;;  %79 = vmatpush.msra.mxu0 %v55_v0  ;;  %v99_v3 = vld [vmem:[%s395_s3 + $0x70] sm:$0xff]  ;;  %v98_v4 = vld [vmem:[%s395_s3 + $0x68] sm:$0xff] }
   0xc   :  { %105 = vmatpush.msra.mxu1 %v100_v2  ;;  %174 = vmatmul.msk.f32.vlgmr.msra.gmra.mxu0 %vm60_vm0, %v54_v1  ;;  %v97_v5 = vld [vmem:[%s395_s3 + $0x60] sm:$0xff]  ;;  %v96_v6 = vld [vmem:[%s395_s3 + $0x58] sm:$0xff]  ;;  %v95_v7 = vld [vmem:[%s395_s3 + $0x50] sm:$0xff] }
   0xd   :  { %v94_v8 = vld [vmem:[%s395_s3 + $0x48] sm:$0xff]  ;;  %v93_v9 = vld [vmem:[%s395_s3 + $0x40] sm:$0xff]  ;;  %v92_v10 = vld [vmem:[%s395_s3 + $0x38] sm:$0xff] }
   0xe   :  { %106 = vmatpush.msra.mxu1 %v99_v3  ;;  %v91_v11 = vld [vmem:[%s395_s3 + $0x30] sm:$0xff]  ;;  %v90_v12 = vld [vmem:[%s395_s3 + $0x28] sm:$0xff]  ;;  %v89_v13 = vld [vmem:[%s395_s3 + $0x20] sm:$0xff] }
   0xf   :  { %v88_v14 = vld [vmem:[%s395_s3 + $0x18] sm:$0xff]  ;;  %v87_v15 = vld [vmem:[%s395_s3 + $0x10] sm:$0xff]  ;;  %v86_v16 = vld [vmem:[%s395_s3 + $0x8] sm:$0xff] }
  0x10   :  { %107 = vmatpush.msra.mxu1 %v98_v4  ;;  %v85_v17 = vld [vmem:[%s395_s3] sm:$0xff]  ;;  %v141_v18 = vld [vmem:[%s397_s5 + $0x78] sm:$0xff]  ;;  %v140_v19 = vld [vmem:[%s397_s5 + $0x70] sm:$0xff] }
  0x11   :  { %146 = vmatpush.msra.mxu2 %v141_v18  ;;  %v139_v20 = vld [vmem:[%s397_s5 + $0x68] sm:$0xff]  ;;  %v138_v21 = vld [vmem:[%s397_s5 + $0x60] sm:$0xff]  ;;  %v137_v22 = vld [vmem:[%s397_s5 + $0x58] sm:$0xff] }
  0x12   :  { %108 = vmatpush.msra.mxu1 %v97_v5  ;;  %v136_v23 = vld [vmem:[%s397_s5 + $0x50] sm:$0xff]  ;;  %v135_v24 = vld [vmem:[%s397_s5 + $0x48] sm:$0xff]  ;;  %v134_v25 = vld [vmem:[%s397_s5 + $0x40] sm:$0xff] }
  0x13   :  { %147 = vmatpush.msra.mxu2 %v140_v19  ;;  %v133_v26 = vld [vmem:[%s397_s5 + $0x38] sm:$0xff]  ;;  %v132_v27 = vld [vmem:[%s397_s5 + $0x30] sm:$0xff]  ;;  %v131_v28 = vld [vmem:[%s397_s5 + $0x28] sm:$0xff] }
  0x14   :  { %109 = vmatpush.msra.mxu1 %v96_v6  ;;  %v177_v29 = vld [vmem:[%s394_s2] ss:$0 sm:$0xff]  ;;  %v129_v34 = vld [vmem:[%s397_s5 + $0x18] sm:$0xff]  ;;  %v128_v35 = vld [vmem:[%s397_s5 + $0x10] sm:$0xff] }
  0x15   :  { %148 = vmatpush.msra.mxu2 %v139_v20  ;;  %v130_v33 = vld [vmem:[%s397_s5 + $0x20] sm:$0xff]  ;;  %v127_v36 = vld [vmem:[%s397_s5 + $0x8] sm:$0xff] }
  0x16   :  { %110 = vmatpush.msra.mxu1 %v95_v7  ;;  %v126_v37 = vld [vmem:[%s397_s5] sm:$0xff] }
  0x17   :  { %149 = vmatpush.msra.mxu2 %v138_v21  ;;  %v178_v38 = vld [vmem:[%s396_s4] ss:$0 sm:$0xff] }
  0x18   :  { %111 = vmatpush.msra.mxu1 %v94_v8  ;;  %v179_v42 = vld [vmem:[%s398_s6] ss:$0 sm:$0xff] }
  0x19   :  { %150 = vmatpush.msra.mxu2 %v137_v22 }
  0x1a   :  { %112 = vmatpush.msra.mxu1 %v93_v9 }
  0x1b   :  { %151 = vmatpush.msra.mxu2 %v136_v23 }
  0x1c   :  { %113 = vmatpush.msra.mxu1 %v92_v10 }
  0x1d   :  { %152 = vmatpush.msra.mxu2 %v135_v24 }
  0x1e   :  { %114 = vmatpush.msra.mxu1 %v91_v11 }
  0x1f   :  { %153 = vmatpush.msra.mxu2 %v134_v25 }
  0x20   :  { %115 = vmatpush.msra.mxu1 %v90_v12 }
  0x21   :  { %154 = vmatpush.msra.mxu2 %v133_v26 }
  0x22   :  { %116 = vmatpush.msra.mxu1 %v89_v13 }
  0x23   :  { %155 = vmatpush.msra.mxu2 %v132_v27 }
  0x24   :  { %117 = vmatpush.msra.mxu1 %v88_v14 }
  0x25   :  { %156 = vmatpush.msra.mxu2 %v131_v28 }
  0x26   :  { %118 = vmatpush.msra.mxu1 %v87_v15 }
  0x27   :  { %157 = vmatpush.msra.mxu2 %v130_v33 }
  0x28   :  { %119 = vmatpush.msra.mxu1 %v86_v16 }
  0x29   :  { %158 = vmatpush.msra.mxu2 %v129_v34 }
  0x2a   :  { %120 = vmatpush.msra.mxu1 %v85_v17 }
  0x2b   :  { %159 = vmatpush.msra.mxu2 %v128_v35 }
  0x2d   :  { %160 = vmatpush.msra.mxu2 %v127_v36 }
  0x2f   :  { %161 = vmatpush.msra.mxu2 %v126_v37 }
  0x89   :  { %v81_v30 = vpop.f32.mrf.mxu0 }
  0x8a   :  { %v82_v31 = vadd.f32 %v177_v29, %v81_v30 }
  0x8c   :  { %180 = vtanh.f32 %v82_v31 }
  0x92   :  { %v181_v32 = vpop.eup %180 }
  0x93   :  { %121 = vmatmul.f32.vlgmr.msra.gmra.mxu1 %v181_v32 }
 0x110   :  { %v122_v39 = vpop.f32.mrf.mxu1 }
 0x111   :  { %v123_v40 = vadd.f32 %v178_v38, %v122_v39 }
 0x113   :  { %182 = vtanh.f32 %v123_v40 }
 0x119   :  { %v183_v41 = vpop.eup %182 }
 0x11a   :  { %162 = vmatmul.f32.vlgmr.msra.gmra.mxu2 %v183_v41 }
 0x19d   :  { %v163_v43 = vpop.f32.mrf.mxu2 }
 0x19e   :  { %v164_v44 = vadd.f32 %v179_v42, %v163_v43 }
 0x1a0   :  { %167 = vst.msk [vmem:[%s399_s7] sm:$0xff] %vm166_vm1, %v164_v44 }
 0x1a1   :  { %172 = vsyncpa [#allocation3], 1 }
 0x1a2   :  { %173 = vsyncpa [#allocation5], 1 }

</bundles_post_ra>
